<compile_context>
chip_gen: v5e
topology: v5e:2x2
jax: 0.10.0
libtpu: 0.0.40
codegen_flags: <defaults>
</compile_context>

<pallas_src>
import jax
import jax.numpy as jnp
from jax.experimental import pallas as pl
from jax.experimental.pallas import tpu as pltpu


def _round_up(v, m):
    return (v + m - 1) // m * m


def _tpu_vmem_capacity_bytes():
    """Physical per-core VMEM; conservative 64 MiB fallback if the query fails."""
    try:
        return int(pltpu.get_tpu_info().vmem_capacity_bytes)
    except Exception:
        return 64 * 1024 * 1024


def _pick_tile_n(n, vmem_cap):
    """Node-dimension tile: a multiple of 128 dividing N, capped smaller on 64 MiB
    parts (v7x) than on 128 MiB parts (v5e/v6e); falls back to the full N."""
    max_tile = 256 if vmem_cap <= 64 * 1024 * 1024 else 512
    for cand in (max_tile, 256, 128):
        if cand <= n and n % cand == 0:
            return cand
    return n


def _vmem_limit_bytes(c_in, c_out, n, k, tn, vmem_cap):
    """Scoped-VMEM budget from padded block sizes, capped below physical VMEM."""
    def tile(rows, cols, elt=4):
        return _round_up(max(rows, 1), 8) * _round_up(max(cols, 1), 128) * elt

    x_blk = tile(c_in, n)
    idx_blk = 2 * tile(k, tn)
    w_blk = tile(c_out, 2 * c_in)
    b_blk = tile(c_out, 1)
    o_blk = tile(c_out, tn)
    # in-kernel transients: row iota + one-hot selects (f32) + bf16 D + rel/x_tile/h/out
    transient = (3 * tile(n, tn) + 2 * tile(n, tn, 2)
                 + 4 * tile(c_in, tn) + tile(2 * c_in, tn) + 2 * tile(c_out, tn))
    est = 2 * (x_blk + idx_blk + w_blk + b_blk + o_blk) + transient  # 2x: double buffers
    limit = max(2 * est, 32 * 1024 * 1024)
    return int(min(limit, int(0.8 * vmem_cap)))


def mr_conv_kernel(x_ref, idxj_ref, idxi_ref, w_ref, b_ref, o_ref):
    """One (batch, node-tile) grid step.

    x_ref:    (1, C_in, N)     f32  all node features of this batch
                                    (channels on sublanes, nodes on lanes)
    idx*_ref: (1, K, tn)       i32  neighbor / center indices for this node tile
    w_ref:    (C_out, 2*C_in)  f32  de-interleaved conv weight [w_x | w_rel]
    b_ref:    (C_out, 1)       f32
    o_ref:    (1, C_out, tn)   f32
    """
    _, c_in, n = x_ref.shape
    k = idxj_ref.shape[1]
    tn = o_ref.shape[2]

    x = x_ref[0]                                  # (C_in, N) f32
    x_bf = x.astype(jnp.bfloat16)                 # bf16 LHS for aggregation matmuls

    # row[m, v] = m : sublane (source-node) index, compared against index rows below.
    row = jax.lax.broadcasted_iota(jnp.int32, (n, tn), 0)

    def rel_k(kk):
        ij = idxj_ref[0, pl.ds(kk, 1), :]         # (1, tn) neighbor ids
        ii = idxi_ref[0, pl.ds(kk, 1), :]         # (1, tn) center ids
        # signed one-hot, exactly representable in bf16:
        #   d[m, v] = [ij[v] == m] - [ii[v] == m]
        d = (jnp.where(ij == row, 1.0, 0.0)
             - jnp.where(ii == row, 1.0, 0.0)).astype(jnp.bfloat16)        # (N, tn)
        # (C_in, N) @ (N, tn) -> x[:, idx_j] - x[:, idx_i], f32 accumulation
        return jnp.dot(x_bf, d, preferred_element_type=jnp.float32)        # (C_in, tn)

    # max-relative aggregation: init from k = 0 (no -inf fill), fori_loop over the rest
    rel = rel_k(0)
    rel = jax.lax.fori_loop(
        1, k, lambda kk, acc: jnp.maximum(acc, rel_k(kk)), rel, unroll=(k <= 8))

    # node-tile slice of x for the direct (non-relative) half of the conv input
    if tn == n:
        x_tile = x
    else:
        start = pl.multiple_of(pl.program_id(1) * tn, tn)
        x_tile = x_ref[0, :, pl.ds(start, tn)]

    # fused 1x1 conv: (C_out, 2*C_in) @ (2*C_in, tn) + bias, then ReLU
    h = jnp.concatenate([x_tile, rel], axis=0)                             # (2*C_in, tn)
    out = jnp.dot(w_ref[...], h, preferred_element_type=jnp.float32)       # (C_out, tn)
    out = out + b_ref[...]                                                 # bias (C_out, 1)
    o_ref[0] = jnp.maximum(out, 0.0).astype(o_ref.dtype)


def mr_conv2d(x_nchw, edge_index, weight, bias):
    """MRConv2d forward (y=None path).

    x_nchw:     (B, C_in, N, 1);  edge_index: (2, B, N, K) int
    weight:     (C_out, 2*C_in, 1, 1);  bias: (C_out,)
    returns     (B, C_out, N, 1) float32
    """
    B, C_in, N, _ = x_nchw.shape
    K = edge_index.shape[-1]
    C_out = weight.shape[0]
    assert weight.shape[1] == 2 * C_in, "MRConv2d conv expects 2*C_in input channels"

    x_bcn = x_nchw[..., 0].astype(jnp.float32)                             # (B, C_in, N)
    # indices as (B, K, N): K on sublanes (pads to 8) instead of lanes (pads to 128)
    idx_j = jnp.transpose(edge_index[0], (0, 2, 1)).astype(jnp.int32)      # (B, K, N)
    idx_i = jnp.transpose(edge_index[1], (0, 2, 1)).astype(jnp.int32)      # (B, K, N)

    w2 = weight[:, :, 0, 0].astype(jnp.float32)                            # (C_out, 2*C_in)
    # torch.cat(...).reshape interleaves channels [x_0, rel_0, x_1, rel_1, ...];
    # de-interleave once here so the kernel runs one stacked [x; rel] matmul.
    w_full = jnp.concatenate([w2[:, 0::2], w2[:, 1::2]], axis=1)           # (C_out, 2*C_in)
    b2 = bias.reshape(C_out, 1).astype(jnp.float32)

    vmem_cap = _tpu_vmem_capacity_bytes()
    tn = _pick_tile_n(N, vmem_cap)
    grid = (B, N // tn)

    out_bcn = pl.pallas_call(
        mr_conv_kernel,
        out_shape=jax.ShapeDtypeStruct((B, C_out, N), jnp.float32),
        grid=grid,
        in_specs=[
            pl.BlockSpec((1, C_in, N), lambda b, j: (b, 0, 0)),       # full x of batch b
            pl.BlockSpec((1, K, tn), lambda b, j: (b, 0, j)),         # neighbor ids tile
            pl.BlockSpec((1, K, tn), lambda b, j: (b, 0, j)),         # center ids tile
            pl.BlockSpec((C_out, 2 * C_in), lambda b, j: (0, 0)),     # fused conv weight
            pl.BlockSpec((C_out, 1), lambda b, j: (0, 0)),            # bias
        ],
        out_specs=pl.BlockSpec((1, C_out, tn), lambda b, j: (b, 0, j)),
        compiler_params=pltpu.CompilerParams(
            dimension_semantics=("parallel", "parallel"),
            vmem_limit_bytes=_vmem_limit_bytes(C_in, C_out, N, K, tn, vmem_cap),
        ),
    )(x_bcn, idx_j, idx_i, w_full, b2)

    return out_bcn[..., None]                                              # (B, C_out, N, 1)


if __name__ == "__main__":
    key = jax.random.PRNGKey(0)
    B, C_in, C_out, N, K = 2, 16, 32, 64, 8
    k1, k2, k3, k4 = jax.random.split(key, 4)

    x = jax.random.normal(k1, (B, C_in, N, 1), dtype=jnp.float32)
    nbr = jax.random.randint(k2, (B, N, K), 0, N, dtype=jnp.int32)          # edge_index[0]
    ctr = jnp.broadcast_to(jnp.arange(N, dtype=jnp.int32)[None, :, None],
                           (B, N, K))                                       # edge_index[1]
    edge_index = jnp.stack([nbr, ctr], axis=0)                              # (2, B, N, K)

    # Conv2d(2*C_in, C_out, 1, bias=True) synthetic params
    weight = jax.random.normal(k3, (C_out, 2 * C_in, 1, 1), dtype=jnp.float32) * 0.1
    bias = jax.random.normal(k4, (C_out,), dtype=jnp.float32) * 0.1

    out = jax.block_until_ready(mr_conv2d(x, edge_index, weight, bias))
    assert out.shape == (B, C_out, N, 1)

    # ---- pure-JAX references (mirror the PyTorch forward) ---------------------------
    w2 = weight[:, :, 0, 0]
    x_sq = x[..., 0]                                                        # (B, C, N)
    gather = jax.vmap(lambda xb, ib: xb[:, ib])                             # (C,N),(N,K)->(C,N,K)

    def forward_ref(x_gather_src):
        x_j = gather(x_gather_src, edge_index[0])
        x_i = gather(x_gather_src, edge_index[1])
        rel = jnp.max(x_j - x_i, axis=-1)                                   # (B, C, N)
        h = jnp.stack([x_sq, rel], axis=2).reshape(B, 2 * C_in, N)          # interleaved
        y = jnp.einsum("oc,bcn->bon", w2, h, precision=jax.lax.Precision.HIGHEST)
        return jnp.maximum(y + bias[None, :, None], 0.0)[..., None]

    # exact fp32 PyTorch math
    ref_f32 = forward_ref(x_sq)
    # identical math but with the bf16 rounding of x used by the kernel's aggregation
    ref_bf16 = forward_ref(x_sq.astype(jnp.bfloat16).astype(jnp.float32))

    assert jnp.allclose(out, ref_bf16, atol=2e-3, rtol=2e-3), "mismatch vs bf16-aware reference"
    assert jnp.allclose(out, ref_f32, atol=8e-2, rtol=8e-2), "mismatch vs fp32 reference"

    print("KERNEL_OK")
</pallas_src>

<mosaic_0001>
module attributes {stable_mosaic.version = 11 : i64} {
  func.func @mr_conv_kernel(%arg0: i32, %arg1: i32, %arg2: memref<1x16x64xf32, #tpu.memory_space<vmem>>, %arg3: memref<1x8x64xi32, #tpu.memory_space<vmem>>, %arg4: memref<1x8x64xi32, #tpu.memory_space<vmem>>, %arg5: memref<32x32xf32, #tpu.memory_space<vmem>>, %arg6: memref<32x1xf32, #tpu.memory_space<vmem>>, %arg7: memref<1x32x64xf32, #tpu.memory_space<vmem>>) attributes {dimension_semantics = [#tpu.dimension_semantics<parallel>, #tpu.dimension_semantics<parallel>], iteration_bounds = array<i64: 2, 1>, scalar_prefetch = 0 : i64, scratch_operands = 0 : i64, tpu.core_type = #tpu.core_type<tc>, window_params = [{transform_indices = @transform_0, window_bounds = array<i64: 1, 16, 64>}, {transform_indices = @transform_1, window_bounds = array<i64: 1, 8, 64>}, {transform_indices = @transform_2, window_bounds = array<i64: 1, 8, 64>}, {pipeline_mode = #tpu.pipeline_mode<synchronous>, transform_indices = @transform_3, window_bounds = array<i64: 32, 32>}, {pipeline_mode = #tpu.pipeline_mode<synchronous>, transform_indices = @transform_4, window_bounds = array<i64: 32, 1>}, {transform_indices = @transform_5, window_bounds = array<i64: 1, 32, 64>}]} {
    %c0 = arith.constant 0 : index
    %c0_0 = arith.constant 0 : index
    %c0_1 = arith.constant 0 : index
    %0 = vector.load %arg2[%c0, %c0_0, %c0_1] : memref<1x16x64xf32, #tpu.memory_space<vmem>>, vector<1x16x64xf32>
    %1 = vector.shape_cast %0 : vector<1x16x64xf32> to vector<16x64xf32>
    %2 = arith.truncf %1 : vector<16x64xf32> to vector<16x64xbf16>
    %3 = tpu.iota {dimensions = array<i32: 0>} : vector<64x64xi32>
    %c0_2 = arith.constant 0 : index
    %c0_3 = arith.constant 0 : index
    %c0_4 = arith.constant 0 : index
    %4 = vector.load %arg3[%c0_2, %c0_3, %c0_4] : memref<1x8x64xi32, #tpu.memory_space<vmem>>, vector<1x1x64xi32>
    %5 = vector.shape_cast %4 : vector<1x1x64xi32> to vector<1x64xi32>
    %c0_5 = arith.constant 0 : index
    %c0_6 = arith.constant 0 : index
    %c0_7 = arith.constant 0 : index
    %6 = vector.load %arg4[%c0_5, %c0_6, %c0_7] : memref<1x8x64xi32, #tpu.memory_space<vmem>>, vector<1x1x64xi32>
    %7 = vector.shape_cast %6 : vector<1x1x64xi32> to vector<1x64xi32>
    %8 = vector.broadcast %5 : vector<1x64xi32> to vector<64x64xi32>
    %9 = arith.cmpi eq, %8, %3 : vector<64x64xi32>
    %cst = arith.constant 1.000000e+00 : f32
    %cst_8 = arith.constant 0.000000e+00 : f32
    %10 = vector.broadcast %cst : f32 to vector<64x64xf32>
    %11 = vector.broadcast %cst_8 : f32 to vector<64x64xf32>
    %12 = arith.select %9, %10, %11 : vector<64x64xi1>, vector<64x64xf32>
    %13 = vector.broadcast %7 : vector<1x64xi32> to vector<64x64xi32>
    %14 = arith.cmpi eq, %13, %3 : vector<64x64xi32>
    %cst_9 = arith.constant 1.000000e+00 : f32
    %cst_10 = arith.constant 0.000000e+00 : f32
    %15 = vector.broadcast %cst_9 : f32 to vector<64x64xf32>
    %16 = vector.broadcast %cst_10 : f32 to vector<64x64xf32>
    %17 = arith.select %14, %15, %16 : vector<64x64xi1>, vector<64x64xf32>
    %18 = arith.subf %12, %17 : vector<64x64xf32>
    %19 = arith.truncf %18 : vector<64x64xf32> to vector<64x64xbf16>
    %cst_11 = arith.constant dense<0.000000e+00> : vector<16x64xf32>
    %20 = tpu.matmul %2, %19, %cst_11 {dimension_numbers = #tpu.dot_dimension_numbers<[1], [0], [0], [1], [0, 0, 1, 1], [], []>} : vector<16x64xbf16>, vector<64x64xbf16>, vector<16x64xf32> -> vector<16x64xf32>
    %c1_i32 = arith.constant 1 : i32
    %c0_12 = arith.constant 0 : index
    %21 = arith.index_cast %c1_i32 : i32 to index
    %c0_13 = arith.constant 0 : index
    %22 = vector.load %arg3[%c0_12, %21, %c0_13] : memref<1x8x64xi32, #tpu.memory_space<vmem>>, vector<1x1x64xi32>
    %23 = vector.shape_cast %22 : vector<1x1x64xi32> to vector<1x64xi32>
    %c0_14 = arith.constant 0 : index
    %24 = arith.index_cast %c1_i32 : i32 to index
    %c0_15 = arith.constant 0 : index
    %25 = vector.load %arg4[%c0_14, %24, %c0_15] : memref<1x8x64xi32, #tpu.memory_space<vmem>>, vector<1x1x64xi32>
    %26 = vector.shape_cast %25 : vector<1x1x64xi32> to vector<1x64xi32>
    %27 = vector.broadcast %23 : vector<1x64xi32> to vector<64x64xi32>
    %28 = arith.cmpi eq, %27, %3 : vector<64x64xi32>
    %cst_16 = arith.constant 1.000000e+00 : f32
    %cst_17 = arith.constant 0.000000e+00 : f32
    %29 = vector.broadcast %cst_16 : f32 to vector<64x64xf32>
    %30 = vector.broadcast %cst_17 : f32 to vector<64x64xf32>
    %31 = arith.select %28, %29, %30 : vector<64x64xi1>, vector<64x64xf32>
    %32 = vector.broadcast %26 : vector<1x64xi32> to vector<64x64xi32>
    %33 = arith.cmpi eq, %32, %3 : vector<64x64xi32>
    %cst_18 = arith.constant 1.000000e+00 : f32
    %cst_19 = arith.constant 0.000000e+00 : f32
    %34 = vector.broadcast %cst_18 : f32 to vector<64x64xf32>
    %35 = vector.broadcast %cst_19 : f32 to vector<64x64xf32>
    %36 = arith.select %33, %34, %35 : vector<64x64xi1>, vector<64x64xf32>
    %37 = arith.subf %31, %36 : vector<64x64xf32>
    %38 = arith.truncf %37 : vector<64x64xf32> to vector<64x64xbf16>
    %cst_20 = arith.constant dense<0.000000e+00> : vector<16x64xf32>
    %39 = tpu.matmul %2, %38, %cst_20 {dimension_numbers = #tpu.dot_dimension_numbers<[1], [0], [0], [1], [0, 0, 1, 1], [], []>} : vector<16x64xbf16>, vector<64x64xbf16>, vector<16x64xf32> -> vector<16x64xf32>
    %40 = arith.maximumf %20, %39 : vector<16x64xf32>
    %c2_i32 = arith.constant 2 : i32
    %c0_21 = arith.constant 0 : index
    %41 = arith.index_cast %c2_i32 : i32 to index
    %c0_22 = arith.constant 0 : index
    %42 = vector.load %arg3[%c0_21, %41, %c0_22] : memref<1x8x64xi32, #tpu.memory_space<vmem>>, vector<1x1x64xi32>
    %43 = vector.shape_cast %42 : vector<1x1x64xi32> to vector<1x64xi32>
    %c0_23 = arith.constant 0 : index
    %44 = arith.index_cast %c2_i32 : i32 to index
    %c0_24 = arith.constant 0 : index
    %45 = vector.load %arg4[%c0_23, %44, %c0_24] : memref<1x8x64xi32, #tpu.memory_space<vmem>>, vector<1x1x64xi32>
    %46 = vector.shape_cast %45 : vector<1x1x64xi32> to vector<1x64xi32>
    %47 = vector.broadcast %43 : vector<1x64xi32> to vector<64x64xi32>
    %48 = arith.cmpi eq, %47, %3 : vector<64x64xi32>
    %cst_25 = arith.constant 1.000000e+00 : f32
    %cst_26 = arith.constant 0.000000e+00 : f32
    %49 = vector.broadcast %cst_25 : f32 to vector<64x64xf32>
    %50 = vector.broadcast %cst_26 : f32 to vector<64x64xf32>
    %51 = arith.select %48, %49, %50 : vector<64x64xi1>, vector<64x64xf32>
    %52 = vector.broadcast %46 : vector<1x64xi32> to vector<64x64xi32>
    %53 = arith.cmpi eq, %52, %3 : vector<64x64xi32>
    %cst_27 = arith.constant 1.000000e+00 : f32
    %cst_28 = arith.constant 0.000000e+00 : f32
    %54 = vector.broadcast %cst_27 : f32 to vector<64x64xf32>
    %55 = vector.broadcast %cst_28 : f32 to vector<64x64xf32>
    %56 = arith.select %53, %54, %55 : vector<64x64xi1>, vector<64x64xf32>
    %57 = arith.subf %51, %56 : vector<64x64xf32>
    %58 = arith.truncf %57 : vector<64x64xf32> to vector<64x64xbf16>
    %cst_29 = arith.constant dense<0.000000e+00> : vector<16x64xf32>
    %59 = tpu.matmul %2, %58, %cst_29 {dimension_numbers = #tpu.dot_dimension_numbers<[1], [0], [0], [1], [0, 0, 1, 1], [], []>} : vector<16x64xbf16>, vector<64x64xbf16>, vector<16x64xf32> -> vector<16x64xf32>
    %60 = arith.maximumf %40, %59 : vector<16x64xf32>
    %c3_i32 = arith.constant 3 : i32
    %c0_30 = arith.constant 0 : index
    %61 = arith.index_cast %c3_i32 : i32 to index
    %c0_31 = arith.constant 0 : index
    %62 = vector.load %arg3[%c0_30, %61, %c0_31] : memref<1x8x64xi32, #tpu.memory_space<vmem>>, vector<1x1x64xi32>
    %63 = vector.shape_cast %62 : vector<1x1x64xi32> to vector<1x64xi32>
    %c0_32 = arith.constant 0 : index
    %64 = arith.index_cast %c3_i32 : i32 to index
    %c0_33 = arith.constant 0 : index
    %65 = vector.load %arg4[%c0_32, %64, %c0_33] : memref<1x8x64xi32, #tpu.memory_space<vmem>>, vector<1x1x64xi32>
    %66 = vector.shape_cast %65 : vector<1x1x64xi32> to vector<1x64xi32>
    %67 = vector.broadcast %63 : vector<1x64xi32> to vector<64x64xi32>
    %68 = arith.cmpi eq, %67, %3 : vector<64x64xi32>
    %cst_34 = arith.constant 1.000000e+00 : f32
    %cst_35 = arith.constant 0.000000e+00 : f32
    %69 = vector.broadcast %cst_34 : f32 to vector<64x64xf32>
    %70 = vector.broadcast %cst_35 : f32 to vector<64x64xf32>
    %71 = arith.select %68, %69, %70 : vector<64x64xi1>, vector<64x64xf32>
    %72 = vector.broadcast %66 : vector<1x64xi32> to vector<64x64xi32>
    %73 = arith.cmpi eq, %72, %3 : vector<64x64xi32>
    %cst_36 = arith.constant 1.000000e+00 : f32
    %cst_37 = arith.constant 0.000000e+00 : f32
    %74 = vector.broadcast %cst_36 : f32 to vector<64x64xf32>
    %75 = vector.broadcast %cst_37 : f32 to vector<64x64xf32>
    %76 = arith.select %73, %74, %75 : vector<64x64xi1>, vector<64x64xf32>
    %77 = arith.subf %71, %76 : vector<64x64xf32>
    %78 = arith.truncf %77 : vector<64x64xf32> to vector<64x64xbf16>
    %cst_38 = arith.constant dense<0.000000e+00> : vector<16x64xf32>
    %79 = tpu.matmul %2, %78, %cst_38 {dimension_numbers = #tpu.dot_dimension_numbers<[1], [0], [0], [1], [0, 0, 1, 1], [], []>} : vector<16x64xbf16>, vector<64x64xbf16>, vector<16x64xf32> -> vector<16x64xf32>
    %80 = arith.maximumf %60, %79 : vector<16x64xf32>
    %c4_i32 = arith.constant 4 : i32
    %c0_39 = arith.constant 0 : index
    %81 = arith.index_cast %c4_i32 : i32 to index
    %c0_40 = arith.constant 0 : index
    %82 = vector.load %arg3[%c0_39, %81, %c0_40] : memref<1x8x64xi32, #tpu.memory_space<vmem>>, vector<1x1x64xi32>
    %83 = vector.shape_cast %82 : vector<1x1x64xi32> to vector<1x64xi32>
    %c0_41 = arith.constant 0 : index
    %84 = arith.index_cast %c4_i32 : i32 to index
    %c0_42 = arith.constant 0 : index
    %85 = vector.load %arg4[%c0_41, %84, %c0_42] : memref<1x8x64xi32, #tpu.memory_space<vmem>>, vector<1x1x64xi32>
    %86 = vector.shape_cast %85 : vector<1x1x64xi32> to vector<1x64xi32>
    %87 = vector.broadcast %83 : vector<1x64xi32> to vector<64x64xi32>
    %88 = arith.cmpi eq, %87, %3 : vector<64x64xi32>
    %cst_43 = arith.constant 1.000000e+00 : f32
    %cst_44 = arith.constant 0.000000e+00 : f32
    %89 = vector.broadcast %cst_43 : f32 to vector<64x64xf32>
    %90 = vector.broadcast %cst_44 : f32 to vector<64x64xf32>
    %91 = arith.select %88, %89, %90 : vector<64x64xi1>, vector<64x64xf32>
    %92 = vector.broadcast %86 : vector<1x64xi32> to vector<64x64xi32>
    %93 = arith.cmpi eq, %92, %3 : vector<64x64xi32>
    %cst_45 = arith.constant 1.000000e+00 : f32
    %cst_46 = arith.constant 0.000000e+00 : f32
    %94 = vector.broadcast %cst_45 : f32 to vector<64x64xf32>
    %95 = vector.broadcast %cst_46 : f32 to vector<64x64xf32>
    %96 = arith.select %93, %94, %95 : vector<64x64xi1>, vector<64x64xf32>
    %97 = arith.subf %91, %96 : vector<64x64xf32>
    %98 = arith.truncf %97 : vector<64x64xf32> to vector<64x64xbf16>
    %cst_47 = arith.constant dense<0.000000e+00> : vector<16x64xf32>
    %99 = tpu.matmul %2, %98, %cst_47 {dimension_numbers = #tpu.dot_dimension_numbers<[1], [0], [0], [1], [0, 0, 1, 1], [], []>} : vector<16x64xbf16>, vector<64x64xbf16>, vector<16x64xf32> -> vector<16x64xf32>
    %100 = arith.maximumf %80, %99 : vector<16x64xf32>
    %c5_i32 = arith.constant 5 : i32
    %c0_48 = arith.constant 0 : index
    %101 = arith.index_cast %c5_i32 : i32 to index
    %c0_49 = arith.constant 0 : index
    %102 = vector.load %arg3[%c0_48, %101, %c0_49] : memref<1x8x64xi32, #tpu.memory_space<vmem>>, vector<1x1x64xi32>
    %103 = vector.shape_cast %102 : vector<1x1x64xi32> to vector<1x64xi32>
    %c0_50 = arith.constant 0 : index
    %104 = arith.index_cast %c5_i32 : i32 to index
    %c0_51 = arith.constant 0 : index
    %105 = vector.load %arg4[%c0_50, %104, %c0_51] : memref<1x8x64xi32, #tpu.memory_space<vmem>>, vector<1x1x64xi32>
    %106 = vector.shape_cast %105 : vector<1x1x64xi32> to vector<1x64xi32>
    %107 = vector.broadcast %103 : vector<1x64xi32> to vector<64x64xi32>
    %108 = arith.cmpi eq, %107, %3 : vector<64x64xi32>
    %cst_52 = arith.constant 1.000000e+00 : f32
    %cst_53 = arith.constant 0.000000e+00 : f32
    %109 = vector.broadcast %cst_52 : f32 to vector<64x64xf32>
    %110 = vector.broadcast %cst_53 : f32 to vector<64x64xf32>
    %111 = arith.select %108, %109, %110 : vector<64x64xi1>, vector<64x64xf32>
    %112 = vector.broadcast %106 : vector<1x64xi32> to vector<64x64xi32>
    %113 = arith.cmpi eq, %112, %3 : vector<64x64xi32>
    %cst_54 = arith.constant 1.000000e+00 : f32
    %cst_55 = arith.constant 0.000000e+00 : f32
    %114 = vector.broadcast %cst_54 : f32 to vector<64x64xf32>
    %115 = vector.broadcast %cst_55 : f32 to vector<64x64xf32>
    %116 = arith.select %113, %114, %115 : vector<64x64xi1>, vector<64x64xf32>
    %117 = arith.subf %111, %116 : vector<64x64xf32>
    %118 = arith.truncf %117 : vector<64x64xf32> to vector<64x64xbf16>
    %cst_56 = arith.constant dense<0.000000e+00> : vector<16x64xf32>
    %119 = tpu.matmul %2, %118, %cst_56 {dimension_numbers = #tpu.dot_dimension_numbers<[1], [0], [0], [1], [0, 0, 1, 1], [], []>} : vector<16x64xbf16>, vector<64x64xbf16>, vector<16x64xf32> -> vector<16x64xf32>
    %120 = arith.maximumf %100, %119 : vector<16x64xf32>
    %c6_i32 = arith.constant 6 : i32
    %c0_57 = arith.constant 0 : index
    %121 = arith.index_cast %c6_i32 : i32 to index
    %c0_58 = arith.constant 0 : index
    %122 = vector.load %arg3[%c0_57, %121, %c0_58] : memref<1x8x64xi32, #tpu.memory_space<vmem>>, vector<1x1x64xi32>
    %123 = vector.shape_cast %122 : vector<1x1x64xi32> to vector<1x64xi32>
    %c0_59 = arith.constant 0 : index
    %124 = arith.index_cast %c6_i32 : i32 to index
    %c0_60 = arith.constant 0 : index
    %125 = vector.load %arg4[%c0_59, %124, %c0_60] : memref<1x8x64xi32, #tpu.memory_space<vmem>>, vector<1x1x64xi32>
    %126 = vector.shape_cast %125 : vector<1x1x64xi32> to vector<1x64xi32>
    %127 = vector.broadcast %123 : vector<1x64xi32> to vector<64x64xi32>
    %128 = arith.cmpi eq, %127, %3 : vector<64x64xi32>
    %cst_61 = arith.constant 1.000000e+00 : f32
    %cst_62 = arith.constant 0.000000e+00 : f32
    %129 = vector.broadcast %cst_61 : f32 to vector<64x64xf32>
    %130 = vector.broadcast %cst_62 : f32 to vector<64x64xf32>
    %131 = arith.select %128, %129, %130 : vector<64x64xi1>, vector<64x64xf32>
    %132 = vector.broadcast %126 : vector<1x64xi32> to vector<64x64xi32>
    %133 = arith.cmpi eq, %132, %3 : vector<64x64xi32>
    %cst_63 = arith.constant 1.000000e+00 : f32
    %cst_64 = arith.constant 0.000000e+00 : f32
    %134 = vector.broadcast %cst_63 : f32 to vector<64x64xf32>
    %135 = vector.broadcast %cst_64 : f32 to vector<64x64xf32>
    %136 = arith.select %133, %134, %135 : vector<64x64xi1>, vector<64x64xf32>
    %137 = arith.subf %131, %136 : vector<64x64xf32>
    %138 = arith.truncf %137 : vector<64x64xf32> to vector<64x64xbf16>
    %cst_65 = arith.constant dense<0.000000e+00> : vector<16x64xf32>
    %139 = tpu.matmul %2, %138, %cst_65 {dimension_numbers = #tpu.dot_dimension_numbers<[1], [0], [0], [1], [0, 0, 1, 1], [], []>} : vector<16x64xbf16>, vector<64x64xbf16>, vector<16x64xf32> -> vector<16x64xf32>
    %140 = arith.maximumf %120, %139 : vector<16x64xf32>
    %c7_i32 = arith.constant 7 : i32
    %c0_66 = arith.constant 0 : index
    %141 = arith.index_cast %c7_i32 : i32 to index
    %c0_67 = arith.constant 0 : index
    %142 = vector.load %arg3[%c0_66, %141, %c0_67] : memref<1x8x64xi32, #tpu.memory_space<vmem>>, vector<1x1x64xi32>
    %143 = vector.shape_cast %142 : vector<1x1x64xi32> to vector<1x64xi32>
    %c0_68 = arith.constant 0 : index
    %144 = arith.index_cast %c7_i32 : i32 to index
    %c0_69 = arith.constant 0 : index
    %145 = vector.load %arg4[%c0_68, %144, %c0_69] : memref<1x8x64xi32, #tpu.memory_space<vmem>>, vector<1x1x64xi32>
    %146 = vector.shape_cast %145 : vector<1x1x64xi32> to vector<1x64xi32>
    %147 = vector.broadcast %143 : vector<1x64xi32> to vector<64x64xi32>
    %148 = arith.cmpi eq, %147, %3 : vector<64x64xi32>
    %cst_70 = arith.constant 1.000000e+00 : f32
    %cst_71 = arith.constant 0.000000e+00 : f32
    %149 = vector.broadcast %cst_70 : f32 to vector<64x64xf32>
    %150 = vector.broadcast %cst_71 : f32 to vector<64x64xf32>
    %151 = arith.select %148, %149, %150 : vector<64x64xi1>, vector<64x64xf32>
    %152 = vector.broadcast %146 : vector<1x64xi32> to vector<64x64xi32>
    %153 = arith.cmpi eq, %152, %3 : vector<64x64xi32>
    %cst_72 = arith.constant 1.000000e+00 : f32
    %cst_73 = arith.constant 0.000000e+00 : f32
    %154 = vector.broadcast %cst_72 : f32 to vector<64x64xf32>
    %155 = vector.broadcast %cst_73 : f32 to vector<64x64xf32>
    %156 = arith.select %153, %154, %155 : vector<64x64xi1>, vector<64x64xf32>
    %157 = arith.subf %151, %156 : vector<64x64xf32>
    %158 = arith.truncf %157 : vector<64x64xf32> to vector<64x64xbf16>
    %cst_74 = arith.constant dense<0.000000e+00> : vector<16x64xf32>
    %159 = tpu.matmul %2, %158, %cst_74 {dimension_numbers = #tpu.dot_dimension_numbers<[1], [0], [0], [1], [0, 0, 1, 1], [], []>} : vector<16x64xbf16>, vector<64x64xbf16>, vector<16x64xf32> -> vector<16x64xf32>
    %160 = arith.maximumf %140, %159 : vector<16x64xf32>
    %c7_i32_75 = arith.constant 7 : i32
    %161 = tpu.concatenate %1, %160 in 0 : vector<16x64xf32>, vector<16x64xf32> -> vector<32x64xf32>
    %c0_76 = arith.constant 0 : index
    %c0_77 = arith.constant 0 : index
    %162 = vector.load %arg5[%c0_76, %c0_77] : memref<32x32xf32, #tpu.memory_space<vmem>>, vector<32x32xf32>
    %cst_78 = arith.constant dense<0.000000e+00> : vector<32x64xf32>
    %163 = tpu.matmul %162, %161, %cst_78 {dimension_numbers = #tpu.dot_dimension_numbers<[1], [0], [0], [1], [0, 0, 1, 1], [], []>} : vector<32x32xf32>, vector<32x64xf32>, vector<32x64xf32> -> vector<32x64xf32>
    %c0_79 = arith.constant 0 : index
    %c0_80 = arith.constant 0 : index
    %164 = vector.load %arg6[%c0_79, %c0_80] : memref<32x1xf32, #tpu.memory_space<vmem>>, vector<32x1xf32>
    %165 = vector.broadcast %164 : vector<32x1xf32> to vector<32x64xf32>
    %166 = arith.addf %163, %165 : vector<32x64xf32>
    %cst_81 = arith.constant 0.000000e+00 : f32
    %167 = vector.broadcast %cst_81 : f32 to vector<32x64xf32>
    %168 = arith.maximumf %166, %167 : vector<32x64xf32>
    %c0_82 = arith.constant 0 : index
    %c0_83 = arith.constant 0 : index
    %c0_84 = arith.constant 0 : index
    %169 = vector.load %arg7[%c0_82, %c0_83, %c0_84] : memref<1x32x64xf32, #tpu.memory_space<vmem>>, vector<1x32x64xf32>
    %170 = vector.shape_cast %169 : vector<1x32x64xf32> to vector<32x64xf32>
    %171 = vector.shape_cast %168 : vector<32x64xf32> to vector<1x32x64xf32>
    tpu.vector_store %arg7[%c0_82, %c0_83, %c0_84], %171 {strides = array<i32>} : memref<1x32x64xf32, #tpu.memory_space<vmem>>, vector<1x32x64xf32>,
    return
  }
  func.func @transform_0(%arg0: i32, %arg1: i32) -> (i32, i32, i32) {
    %c0_i32 = arith.constant 0 : i32
    %c0_i32_0 = arith.constant 0 : i32
    %c0_i32_1 = arith.constant 0 : i32
    return %arg0, %c0_i32, %c0_i32_0 : i32, i32, i32
  }
  func.func @transform_1(%arg0: i32, %arg1: i32) -> (i32, i32, i32) {
    %c0_i32 = arith.constant 0 : i32
    %c0_i32_0 = arith.constant 0 : i32
    return %arg0, %c0_i32, %arg1 : i32, i32, i32
  }
  func.func @transform_2(%arg0: i32, %arg1: i32) -> (i32, i32, i32) {
    %c0_i32 = arith.constant 0 : i32
    %c0_i32_0 = arith.constant 0 : i32
    return %arg0, %c0_i32, %arg1 : i32, i32, i32
  }
  func.func @transform_3(%arg0: i32, %arg1: i32) -> (i32, i32) {
    %c0_i32 = arith.constant 0 : i32
    %c0_i32_0 = arith.constant 0 : i32
    %c0_i32_1 = arith.constant 0 : i32
    return %c0_i32, %c0_i32_0 : i32, i32
  }
  func.func @transform_4(%arg0: i32, %arg1: i32) -> (i32, i32) {
    %c0_i32 = arith.constant 0 : i32
    %c0_i32_0 = arith.constant 0 : i32
    %c0_i32_1 = arith.constant 0 : i32
    return %c0_i32, %c0_i32_0 : i32, i32
  }
  func.func @transform_5(%arg0: i32, %arg1: i32) -> (i32, i32, i32) {
    %c0_i32 = arith.constant 0 : i32
    %c0_i32_0 = arith.constant 0 : i32
    return %arg0, %c0_i32, %arg1 : i32, i32, i32
  }
}

</mosaic_0001>

<bundles_post_ra>
// kernel: tpu_custom_call.1
= control target key start
LH: loop header
LB: loop body
LE: loop exit
PB: predicated region body
PF: predicated region fallthrough
CT: control target
= control target key end

     0   :  { %s2114_s0 = inlined_call_operand.vmem [shape: f32[2,16,64], index: 0, kind: input, shape index: {}]   ;;  %s2115_s1 = inlined_call_operand.hbm [shape: s32[2,8,64], index: 1, kind: input, shape index: {}]   ;;  %s2116_s2 = inlined_call_operand.hbm [shape: s32[2,8,64], index: 2, kind: input, shape index: {}]   ;;  %s2117_s3 = inlined_call_operand.hbm [shape: f32[32,32], index: 3, kind: input, shape index: {}]   ;;  %s2118_s4 = inlined_call_operand.vmem [shape: f32[32,1], index: 4, kind: input, shape index: {}]   ;;  %s2119_s5 = inlined_call_operand.hbm [shape: f32[2,32,64], index: 5, kind: output, shape index: {}]  }
   0x1   :  { %2124 = sst [smem:[#allocation18_spill]] %s2117_s3 }
   0x2   :  { %10 = vsyncpa [#allocation3], 0 }
   0x3   :  { %12 = vsyncpa [#allocation3 + $0x1], 0 }
   0x4   :  { %13 = vsyncpa [#allocation6], 0 }
   0x5   :  { %15 = vsyncpa [#allocation6 + $0x1], 0 }
   0x6   :  { %16 = vsyncpa [#allocation4], 0 }
   0x7   :  { %18 = vsyncpa [#allocation4 + $0x1], 0  ;;  %s1448_s18 = smov 0   ;;  %s1450_s19 = smov 0  }
   0x8   :  { %s1452_s20 = smov 0   ;;  %s1454_s21 = smov 0  }
   0x9   :  { %s1456_s22 = smov 0   ;;  %s1458_s23 = smov 0  }
   0xa LB: > { %2125 = sst [smem:[#allocation13_spill]] %s1397_s20  ;;  %s1479_s24 = sadd.s32 4294967295, %s1409_s23   ;;  %s1409_s23 = sphi %s1458_s23, %s24_s23   ;;  %s1405_s22 = sphi %s1456_s22, %s2140_s22   ;;  %s1401_s21 = sphi %s1454_s21, %s2139_s21   ;;  %s1397_s20 = sphi %s1452_s20, %s2138_s20   ;;  %s1393_s19 = sphi %s1450_s19, %s2142_s19   ;;  %s1389_s18 = sphi %s1448_s18, %s2141_s18  }
   0xb   : > { %2126 = sst [smem:[#allocation14_spill]] %s1405_s22  ;;  %p1090_p0 = scmp.ge.s32.totalorder %s1409_s23, 1 }
   0xc   : > { %p85_p1 = scmp.eq.s32.totalorder %s1479_s24, 0  ;;  %p193_p2 = scmp.lt.s32.totalorder %s1409_s23, 3 }
   0xd   : > { %s2127_s3 = sld [smem:[#allocation18_spill]]  ;;  %s1411_s29 = smov [#allocation7]  }
   0xe   : > { %p1487_p3 = pnand %p1090_p0, %p193_p2  ;;  %s206_s30 = sshll.u32 %s1411_s29, 4  ;;  %s207_s30 = int_to_ptr.vmem [resolvable:$true] %s206_s30 }
   0xf   : > { %p1092_p6 = scmp.ge.s32.totalorder %s1409_s23, 2  ;;  %s1412_s6 = smov 128  }
  0x10   : > { %p1137_p4 = pneg %p1487_p3  ;;  %s1413_s7 = smov 8  }
  0x11   : > { %s1089_s8 = sadd.s32 4294967294, %s1409_s23   ;;  %s36_s9 = sadd.s32 1, %s1405_s22 }
  0x12   : > { %p1138_p5 = pnand %p1137_p4, %p85_p1  ;;  %s71_s10 = sadd.s32 1, %s1397_s20 }
  0x13   : > { %s204_s27 = sshll.u32 %s2127_s3, 4  ;;  %p38_p7 = scmp.ge.s32.totalorder %s36_s9, 2  ;;  %s205_s27 = int_to_ptr.hbm [resolvable:$true] %s204_s27 }
  0x14   : > { %1140 = dma.hbm_to_vmem [thread:$0]  (!%p1138_p5), %s205_s27, 512, %s207_s30, [#allocation6], %s1412_s6, %s1412_s6, %s1413_s7  }
  0x15   : > { %p78_p8 = scmp.ne.s32.totalorder %s1397_s20, %s1393_s19  ;;  %p79_p9 = scmp.eq.s32.totalorder %s1409_s23, 0 }
  0x16   : > { %p84_p10 = scmp.ne.s32.totalorder %s1393_s19, %s1389_s18  ;;  %s2144_s9 = smov (%p38_p7, %s36_s9), 0 }
  0x17   : > { %2129 = sst [smem:[#allocation15_spill]] %s2144_s9  ;;  %p1506_p11 = por %p79_p9, %p78_p8 }
  0x18   : > { %p1512_p12 = por %p85_p1, %p84_p10  ;;  %s66_s13 = ssub.s32 %s1405_s22, %s2144_s9 }
  0x19   : > { %p180_p13 = scmp.eq.s32.totalorder %s1479_s24, 1  ;;  %p69_p0 = scmp.eq.s32.totalorder %s66_s13, 0 }
  0x1a   : > { %p186_p2 = scmp.eq.s32.totalorder %s1089_s8, 1  ;;  %p1153_p5 = scmp.lt.s32.totalorder %s1409_s23, 2 }
  0x1b   : > { %p1519_p4 = por %p180_p13, %p78_p8  ;;  %s231_s17 = sand.u32 1, %s1397_s20  }
  0x1c   : > { %s1525_s15 = scalar_select %p69_p0, %s1397_s20, %s71_s10  }
  0x1d   : > { %p1527_p7 = por %p186_p2, %p84_p10  ;;  %s1093_s25 = sshll.u32 %s231_s17, 3 }
  0x1e   : > { %2133 = sst [smem:[#allocation16_spill]] %s1525_s15  ;;  %s1094_s26 = sshll.u32 %s1405_s22, 3 }
  0x1f   : > { %s2134_s16 = scalar_select %p1527_p7, 1, 0 }
  0x20   : > { %s240_s30 = scalar_lea.hbm %s2115_s1, %s1094_s26  ;;  %s235_s6 = scalar_lea.vmem [#allocation2], %s1093_s25 }
  0x21   : > { %2135 = sst [smem:[#allocation17_spill]] %s2134_s16  ;;  %s244_s7 = sshll.u32 %s235_s6, 4  ;;  %s245_s7 = int_to_ptr.vmem [resolvable:$true] %s244_s7 }
  0x22   : > { %s242_s8 = sshll.u32 %s240_s30, 4  ;;  %p1142_p8 = pnand %p1153_p5, %p1506_p11  ;;  %s243_s8 = int_to_ptr.hbm [resolvable:$true] %s242_s8 }
  0x23   : > { %s260_s3 = scalar_lea.hbm %s2116_s2, %s1094_s26  ;;  %s251_s9 = sand.u32 1, %s1409_s23  }
  0x24   : > { %s232_s15 = scalar_lea.sflag [#allocation3], %s231_s17  ;;  %s262_s20 = sshll.u32 %s260_s3, 4  ;;  %s263_s20 = int_to_ptr.hbm [resolvable:$true] %s262_s20 }
  0x25   : > { %1144 = dma.hbm_to_vmem [thread:$0]  (!%p1142_p8), %s243_s8, 128, %s245_s7, %s232_s15  }
  0x26   : > { %s255_s22 = scalar_lea.vmem [#allocation5], %s1093_s25  ;;  %s252_s27 = scalar_lea.sflag [#allocation6], %s251_s9 }
  0x27   : > { %s264_s16 = sshll.u32 %s255_s22, 4  ;;  %273 = sbr.rel (%p1487_p3) target bundleno = 451 (0x1c3), region = 40  ;;  %s265_s16 = int_to_ptr.vmem [resolvable:$true] %s264_s16 }
  0x28   : > { %1147 = dma.hbm_to_vmem [thread:$0]  (!%p1142_p8), %s263_s20, 128, %s265_s16, %s252_s27  }
  0x29   : > { %s1545_s11 = sand.u32 (!%p1487_p3), 1, %s1393_s19  }
  0x2a   : > { %s1098_s26 = sshll.u32 (!%p1487_p3), %s1545_s11, 3  ;;  %s276_s29 = scalar_lea.sflag (!%p1487_p3), [#allocation3], %s1545_s11 }
  0x2b   : > { %s1549_s17 = scalar_lea.vmem (!%p1487_p3), [#allocation2], %s1098_s26 }
  0x2c   : > { %1372 = dma.done.wait (%p1512_p12), %s276_s29, 128  }
  0x2d   : > { %1374 = vsyncadd (%p1512_p12), %s276_s29, 4294967168  ;;  %s285_s3 = sand.u32 1, %s1479_s24   ;;  %s1556_s22 = scalar_lea.vmem [#allocation5], %s1098_s26 }
  0x2e   : > { %s286_s20 = scalar_lea.sflag [#allocation6], %s285_s3 }
  0x2f   : > { %1376 = dma.done.wait (%p1512_p12), %s286_s20, 128  }
  0x30   : > { %1378 = vsyncadd (%p1512_p12), %s286_s20, 4294967168 }
  0x31   : > { %1380 = dma.done.wait (%p85_p1), [#allocation6], 512  }
  0x32   : > { %1382 = vsyncadd (%p85_p1), [#allocation6], 4294966784  ;;  %v341_v0 = vlaneseq  ;;  %v1590_v9 = vld [vmem:[%s1549_s17] ss:$0 sm:$0xff]  ;;  %v1593_v10 = vld [vmem:[%s1556_s22] ss:$0 sm:$0xff] }
  0x33   : > { %v1604_v11 = vld [vmem:[%s1549_s17 + $0x2] ss:$0 sm:$0xff]  ;;  %v1414_v12 = vmov 0.0   ;;  %v1613_v15 = vld [vmem:[%s1556_s22 + $0x2] ss:$0 sm:$0xff]  ;;  %p332_p1 = scmp.lt.s32.totalorder %s1401_s21, 1 }
  0x34   : > { %v1566_v1 = vshrl.u32 %v341_v0, 7  ;;  %v1620_v20 = vld [vmem:[%s1549_s17 + $0x3] ss:$0 sm:$0xff]  ;;  %v1634_v29 = vld [vmem:[%s1556_s22 + $0x3] ss:$0 sm:$0xff]  ;;  %s1101_s27 = sshll.u32 %s1545_s11, 5 }
  0x35   : > { %s1676_s24 = scalar_select %p332_p1, %s1401_s21, 1 }
  0x36   : > { %v1569_v2 = vadd.s32 48, %v1566_v1  ;;  %v1572_v3 = vadd.s32 56, %v1566_v1  ;;  %v1575_v4 = vadd.s32 32, %v1566_v1  ;;  %v1578_v5 = vadd.s32 40, %v1566_v1  ;;  %s331_s26 = scalar_lea.vmem [#allocation8], %s1101_s27  ;;  %s1122_s29 = sshll.u32 %s1401_s21, 5 }
  0x37   : > { %v1581_v6 = vadd.s32 16, %v1566_v1  ;;  %v1584_v7 = vadd.s32 24, %v1566_v1  ;;  %v1587_v8 = vadd.s32 8, %v1566_v1  ;;  %s1121_s28 = sshll.u32 %s1676_s24, 4  ;;  %s955_s20 = scalar_lea.hbm %s2119_s5, %s1122_s29 }
  0x38   : > { %vm359_vm0 = vcmp.eq.s32.totalorder %v1590_v9, %v1569_v2  ;;  %vm360_vm1 = vcmp.eq.s32.totalorder %v1590_v9, %v1572_v3  ;;  %vm357_vm2 = vcmp.eq.s32.totalorder %v1590_v9, %v1575_v4  ;;  %vm358_vm3 = vcmp.eq.s32.totalorder %v1590_v9, %v1578_v5  ;;  %s336_s15 = scalar_lea.vmem %s2114_s0, %s1121_s28  ;;  %s958_s24 = sshll.u32 %s955_s20, 4  ;;  %s959_s24 = int_to_ptr.hbm [resolvable:$true] %s958_s24 }
  0x39   : > { %v367_v13 = vsel %vm359_vm0, 1.0, %v1414_v12  ;;  %v368_v14 = vsel %vm360_vm1, 1.0, %v1414_v12  ;;  %vm376_vm4 = vcmp.eq.s32.totalorder %v1593_v10, %v1569_v2  ;;  %vm377_vm5 = vcmp.eq.s32.totalorder %v1593_v10, %v1572_v3  ;;  %s943_s21 = scalar_lea.sflag [#allocation4], %s1545_s11  ;;  %s1333_s28 = sshra.s32 %s959_s24, 4  ;;  %s1334_s28 = int_to_ptr.hbm [resolvable:$true] %s1333_s28 }
  0x3a   : > { %v384_v16 = vsel %vm376_vm4, 1.0, %v1414_v12  ;;  %v385_v17 = vsel %vm377_vm5, 1.0, %v1414_v12  ;;  %v365_v18 = vsel %vm357_vm2, 1.0, %v1414_v12  ;;  %v366_v19 = vsel %vm358_vm3, 1.0, %v1414_v12  ;;  %s1335_s9 = scalar_lea.hbm %s1334_s28, 32  ;;  %s1339_s16 = scalar_lea.hbm %s2119_s5, 64 }
  0x3b   : > { %v392_v21 = vsub.f32 %v367_v13, %v384_v16  ;;  %v393_v22 = vsub.f32 %v368_v14, %v385_v17  ;;  %vm374_vm6 = vcmp.eq.s32.totalorder %v1593_v10, %v1575_v4  ;;  %vm375_vm7 = vcmp.eq.s32.totalorder %v1593_v10, %v1578_v5  ;;  %p1336_p3 = scmp.ne.s32.totalorder %s1334_s28, %s1335_s9  ;;  %p1340_p11 = scmp.lt.s32.totalorder %s1334_s28, %s2119_s5 }
  0x3c   : > { %v382_v23 = vsel %vm374_vm6, 1.0, %v1414_v12  ;;  %v383_v24 = vsel %vm375_vm7, 1.0, %v1414_v12  ;;  %vm489_vm8 = vcmp.eq.s32.totalorder %v1604_v11, %v1569_v2  ;;  %vm490_vm9 = vcmp.eq.s32.totalorder %v1604_v11, %v1572_v3  ;;  %p1341_p12 = scmp.lt.s32.totalorder %s1339_s16, %s1335_s9 }
  0x3d   : > { %v397_v25 = vpack.c.bf16 %v393_v22, %v392_v21  ;;  %v390_v26 = vsub.f32 %v365_v18, %v382_v23  ;;  %v391_v27 = vsub.f32 %v366_v19, %v383_v24  ;;  %v497_v28 = vsel %vm489_vm8, 1.0, %v1414_v12  ;;  %v1728_v22 = vld [vmem:[%s336_s15] sm:$0xff]  ;;  %v1730_v23 = vld [vmem:[%s336_s15 + $0x8] sm:$0xff]  ;;  %p1337_p9 = pnand %p1336_p3, %p1519_p4 }
  0x3e   : > { %v498_v30 = vsel %vm490_vm9, 1.0, %v1414_v12  ;;  %vm506_vm10 = vcmp.eq.s32.totalorder %v1613_v15, %v1569_v2  ;;  %vm507_vm11 = vcmp.eq.s32.totalorder %v1613_v15, %v1572_v3  ;;  %vm553_vm12 = vcmp.eq.s32.totalorder %v1620_v20, %v1569_v2  ;;  %v1733_v24 = vld [vmem:[%s1549_s17 + $0x1] ss:$0 sm:$0xff]  ;;  %p1342_p13 = por %p1341_p12, %p1340_p11 }
  0x3f   : > { %406 = vmatpush.bf16.msra.mxu1 %v397_v25  ;;  %v396_v31 = vpack.c.bf16 %v391_v27, %v390_v26  ;;  %v514_v32 = vsel %vm506_vm10, 1.0, %v1414_v12  ;;  %v515_v33 = vsel %vm507_vm11, 1.0, %v1414_v12  ;;  %vm554_vm13 = vcmp.eq.s32.totalorder %v1620_v20, %v1572_v3  ;;  %p1338_p10 = pneg %p1337_p9 }
  0x40   : > { %v522_v34 = vsub.f32 %v497_v28, %v514_v32  ;;  %v523_v35 = vsub.f32 %v498_v30, %v515_v33  ;;  %v561_v36 = vsel %vm553_vm12, 1.0, %v1414_v12  ;;  %v562_v37 = vsel %vm554_vm13, 1.0, %v1414_v12  ;;  %v1738_v30 = vld [vmem:[%s1556_s22 + $0x1] ss:$0 sm:$0xff] }
  0x41   : > { %vm570_vm14 = vcmp.eq.s32.totalorder %v1634_v29, %v1569_v2  ;;  %vm571_vm15 = vcmp.eq.s32.totalorder %v1634_v29, %v1572_v3  ;;  %vm355_vm0 = vcmp.eq.s32.totalorder %v1590_v9, %v1581_v6  ;;  %vm356_vm1 = vcmp.eq.s32.totalorder %v1590_v9, %v1584_v7  ;;  %p1343_p0 = pnand %p1342_p13, %p1338_p10 }
  0x42   : > { %v527_v38 = vpack.c.bf16 %v523_v35, %v522_v34  ;;  %v578_v39 = vsel %vm570_vm14, 1.0, %v1414_v12  ;;  %v579_v40 = vsel %vm571_vm15, 1.0, %v1414_v12  ;;  %v363_v41 = vsel %vm355_vm0, 1.0, %v1414_v12 }
  0x43   : > { %407 = vmatpush.bf16.msra.mxu1 %v396_v31  ;;  %v586_v42 = vsub.f32 %v561_v36, %v578_v39  ;;  %v587_v43 = vsub.f32 %v562_v37, %v579_v40  ;;  %v364_v44 = vsel %vm356_vm1, 1.0, %v1414_v12  ;;  %vm372_vm2 = vcmp.eq.s32.totalorder %v1593_v10, %v1581_v6 }
  0x44   : > { %532 = vmatpush.bf16.msra.mxu2 %v527_v38  ;;  %vm373_vm3 = vcmp.eq.s32.totalorder %v1593_v10, %v1584_v7  ;;  %v380_v45 = vsel %vm372_vm2, 1.0, %v1414_v12  ;;  %vm487_vm4 = vcmp.eq.s32.totalorder %v1604_v11, %v1575_v4  ;;  %vm488_vm5 = vcmp.eq.s32.totalorder %v1604_v11, %v1578_v5 }
  0x45   : > { %v591_v46 = vpack.c.bf16 %v587_v43, %v586_v42  ;;  %v381_v47 = vsel %vm373_vm3, 1.0, %v1414_v12  ;;  %v388_v48 = vsub.f32 %v363_v41, %v380_v45  ;;  %v495_v49 = vsel %vm487_vm4, 1.0, %v1414_v12 }
  0x46   : > { %v389_v50 = vsub.f32 %v364_v44, %v381_v47  ;;  %v496_v51 = vsel %vm488_vm5, 1.0, %v1414_v12  ;;  %vm504_vm6 = vcmp.eq.s32.totalorder %v1613_v15, %v1575_v4  ;;  %vm505_vm7 = vcmp.eq.s32.totalorder %v1613_v15, %v1578_v5 }
  0x47   : > { %596 = vmatpush.bf16.msra.mxu3 %v591_v46  ;;  %v512_v52 = vsel %vm504_vm6, 1.0, %v1414_v12  ;;  %v513_v53 = vsel %vm505_vm7, 1.0, %v1414_v12  ;;  %vm551_vm8 = vcmp.eq.s32.totalorder %v1620_v20, %v1575_v4  ;;  %vm552_vm9 = vcmp.eq.s32.totalorder %v1620_v20, %v1578_v5 }
  0x48   : > { %v395_v54 = vpack.c.bf16 %v389_v50, %v388_v48  ;;  %v520_v55 = vsub.f32 %v495_v49, %v512_v52  ;;  %v521_v56 = vsub.f32 %v496_v51, %v513_v53  ;;  %v559_v57 = vsel %vm551_vm8, 1.0, %v1414_v12  ;;  %v1783_v53 = vld [vmem:[%s1549_s17 + $0x6] ss:$0 sm:$0xff] }
  0x49   : > { %v560_v58 = vsel %vm552_vm9, 1.0, %v1414_v12  ;;  %vm568_vm10 = vcmp.eq.s32.totalorder %v1634_v29, %v1575_v4  ;;  %vm569_vm11 = vcmp.eq.s32.totalorder %v1634_v29, %v1578_v5  ;;  %vm353_vm12 = vcmp.eq.s32.totalorder %v1590_v9, %v1566_v1 }
  0x4a   : > { %408 = vmatpush.bf16.msra.mxu1 %v395_v54  ;;  %v526_v59 = vpack.c.bf16 %v521_v56, %v520_v55  ;;  %v576_v60 = vsel %vm568_vm10, 1.0, %v1414_v12  ;;  %v577_v61 = vsel %vm569_vm11, 1.0, %v1414_v12  ;;  %vm354_vm13 = vcmp.eq.s32.totalorder %v1590_v9, %v1587_v8  ;;  %v1797_v56 = vld [vmem:[%s1556_s22 + $0x6] ss:$0 sm:$0xff] }
  0x4b   : > { %v584_v62 = vsub.f32 %v559_v57, %v576_v60  ;;  %v585_v63 = vsub.f32 %v560_v58, %v577_v61  ;;  %v361_v0 = vsel %vm353_vm12, 1.0, %v1414_v12  ;;  %v362_v13 = vsel %vm354_vm13, 1.0, %v1414_v12  ;;  %v1802_v60 = vld [vmem:[%s1549_s17 + $0x4] ss:$0 sm:$0xff] }
  0x4c   : > { %533 = vmatpush.bf16.msra.mxu2 %v526_v59  ;;  %vm370_vm14 = vcmp.eq.s32.totalorder %v1593_v10, %v1566_v1  ;;  %vm371_vm15 = vcmp.eq.s32.totalorder %v1593_v10, %v1587_v8  ;;  %vm485_vm0 = vcmp.eq.s32.totalorder %v1604_v11, %v1581_v6  ;;  %vm486_vm1 = vcmp.eq.s32.totalorder %v1604_v11, %v1584_v7 }
  0x4d   : > { %v590_v9 = vpack.c.bf16 %v585_v63, %v584_v62  ;;  %v378_v14 = vsel %vm370_vm14, 1.0, %v1414_v12  ;;  %v379_v16 = vsel %vm371_vm15, 1.0, %v1414_v12  ;;  %v493_v17 = vsel %vm485_vm0, 1.0, %v1414_v12 }
  0x4e   : > { %v386_v18 = vsub.f32 %v361_v0, %v378_v14  ;;  %v387_v10 = vsub.f32 %v362_v13, %v379_v16  ;;  %v494_v19 = vsel %vm486_vm1, 1.0, %v1414_v12  ;;  %vm502_vm2 = vcmp.eq.s32.totalorder %v1613_v15, %v1581_v6  ;;  %v1816_v13 = vld [vmem:[%s1556_s22 + $0x4] ss:$0 sm:$0xff] }
  0x4f   : > { %597 = vmatpush.bf16.msra.mxu3 %v590_v9  ;;  %vm503_vm3 = vcmp.eq.s32.totalorder %v1613_v15, %v1584_v7  ;;  %v510_v21 = vsel %vm502_vm2, 1.0, %v1414_v12  ;;  %vm549_vm4 = vcmp.eq.s32.totalorder %v1620_v20, %v1581_v6  ;;  %vm550_vm5 = vcmp.eq.s32.totalorder %v1620_v20, %v1584_v7 }
  0x50   : > { %v394_v25 = vpack.c.bf16 %v387_v10, %v386_v18  ;;  %v511_v26 = vsel %vm503_vm3, 1.0, %v1414_v12  ;;  %v518_v27 = vsub.f32 %v493_v17, %v510_v21  ;;  %v557_v28 = vsel %vm549_vm4, 1.0, %v1414_v12  ;;  %v1822_v17 = vld [vmem:[%s1549_s17 + $0x7] ss:$0 sm:$0xff] }
  0x51   : > { %v519_v31 = vsub.f32 %v494_v19, %v511_v26  ;;  %v558_v32 = vsel %vm550_vm5, 1.0, %v1414_v12  ;;  %vm566_vm6 = vcmp.eq.s32.totalorder %v1634_v29, %v1581_v6  ;;  %vm567_vm7 = vcmp.eq.s32.totalorder %v1634_v29, %v1584_v7  ;;  %v1836_v26 = vld [vmem:[%s1556_s22 + $0x7] ss:$0 sm:$0xff] }
  0x52   : > { %409 = vmatpush.bf16.msra.mxu1 %v394_v25  ;;  %v574_v33 = vsel %vm566_vm6, 1.0, %v1414_v12  ;;  %v575_v34 = vsel %vm567_vm7, 1.0, %v1414_v12  ;;  %v1749_v35 = vpack.c.bf16 %v1730_v23, %v1728_v22  ;;  %vm398_vm8 = vcmask 523264  }
  0x53   : > { %v525_v36 = vpack.c.bf16 %v519_v31, %v518_v27  ;;  %v582_v37 = vsub.f32 %v557_v28, %v574_v33  ;;  %v583_v38 = vsub.f32 %v558_v32, %v575_v34  ;;  %vm425_vm9 = vcmp.eq.s32.totalorder %v1733_v24, %v1569_v2 }
  0x54   : > { %vm426_vm10 = vcmp.eq.s32.totalorder %v1733_v24, %v1572_v3  ;;  %v433_v39 = vsel %vm425_vm9, 1.0, %v1414_v12  ;;  %vm442_vm11 = vcmp.eq.s32.totalorder %v1738_v30, %v1569_v2  ;;  %vm443_vm12 = vcmp.eq.s32.totalorder %v1738_v30, %v1572_v3 }
  0x55   : > { %534 = vmatpush.bf16.msra.mxu2 %v525_v36  ;;  %v589_v40 = vpack.c.bf16 %v583_v38, %v582_v37  ;;  %1104 = vmatmul.msk.bf16.vlgmr.msra.gmra.mxu1 %vm398_vm8, %v1749_v35  ;;  %v434_v41 = vsel %vm426_vm10, 1.0, %v1414_v12  ;;  %v450_v42 = vsel %vm442_vm11, 1.0, %v1414_v12  ;;  %v451_v43 = vsel %vm443_vm12, 1.0, %v1414_v12 }
  0x56   : > { %v458_v44 = vsub.f32 %v433_v39, %v450_v42  ;;  %v459_v45 = vsub.f32 %v434_v41, %v451_v43  ;;  %vm483_vm13 = vcmp.eq.s32.totalorder %v1604_v11, %v1566_v1  ;;  %vm484_vm14 = vcmp.eq.s32.totalorder %v1604_v11, %v1587_v8 }
  0x57   : > { %598 = vmatpush.bf16.msra.mxu3 %v589_v40  ;;  %v491_v46 = vsel %vm483_vm13, 1.0, %v1414_v12  ;;  %v492_v47 = vsel %vm484_vm14, 1.0, %v1414_v12  ;;  %vm500_vm15 = vcmp.eq.s32.totalorder %v1613_v15, %v1566_v1  ;;  %vm501_vm0 = vcmp.eq.s32.totalorder %v1613_v15, %v1587_v8 }
  0x58   : > { %v463_v48 = vpack.c.bf16 %v459_v45, %v458_v44  ;;  %v508_v49 = vsel %vm500_vm15, 1.0, %v1414_v12  ;;  %v509_v50 = vsel %vm501_vm0, 1.0, %v1414_v12  ;;  %vm547_vm1 = vcmp.eq.s32.totalorder %v1620_v20, %v1566_v1 }
  0x59   : > { %v516_v11 = vsub.f32 %v491_v46, %v508_v49  ;;  %v517_v51 = vsub.f32 %v492_v47, %v509_v50  ;;  %vm548_vm2 = vcmp.eq.s32.totalorder %v1620_v20, %v1587_v8  ;;  %v555_v52 = vsel %vm547_vm1, 1.0, %v1414_v12 }
  0x5a   : > { %468 = vmatpush.bf16.msrb.mxu1 %v463_v48  ;;  %v556_v15 = vsel %vm548_vm2, 1.0, %v1414_v12  ;;  %vm564_vm3 = vcmp.eq.s32.totalorder %v1634_v29, %v1566_v1  ;;  %vm565_vm4 = vcmp.eq.s32.totalorder %v1634_v29, %v1587_v8  ;;  %vm423_vm5 = vcmp.eq.s32.totalorder %v1733_v24, %v1575_v4 }
  0x5b   : > { %v524_v54 = vpack.c.bf16 %v517_v51, %v516_v11  ;;  %v572_v20 = vsel %vm564_vm3, 1.0, %v1414_v12  ;;  %v573_v55 = vsel %vm565_vm4, 1.0, %v1414_v12  ;;  %vm424_vm6 = vcmp.eq.s32.totalorder %v1733_v24, %v1578_v5 }
  0x5c   : > { %v580_v57 = vsub.f32 %v555_v52, %v572_v20  ;;  %v581_v58 = vsub.f32 %v556_v15, %v573_v55  ;;  %v431_v59 = vsel %vm423_vm5, 1.0, %v1414_v12  ;;  %v432_v29 = vsel %vm424_vm6, 1.0, %v1414_v12 }
  0x5d   : > { %535 = vmatpush.bf16.msra.mxu2 %v524_v54  ;;  %vm440_vm7 = vcmp.eq.s32.totalorder %v1738_v30, %v1575_v4  ;;  %vm441_vm9 = vcmp.eq.s32.totalorder %v1738_v30, %v1578_v5  ;;  %vm745_vm10 = vcmp.eq.s32.totalorder %v1783_v53, %v1569_v2  ;;  %vm746_vm11 = vcmp.eq.s32.totalorder %v1783_v53, %v1572_v3 }
  0x5e   : > { %v588_v61 = vpack.c.bf16 %v581_v58, %v580_v57  ;;  %v448_v62 = vsel %vm440_vm7, 1.0, %v1414_v12  ;;  %v449_v63 = vsel %vm441_vm9, 1.0, %v1414_v12  ;;  %v753_v0 = vsel %vm745_vm10, 1.0, %v1414_v12 }
  0x5f   : > { %v456_v9 = vsub.f32 %v431_v59, %v448_v62  ;;  %v457_v14 = vsub.f32 %v432_v29, %v449_v63  ;;  %v754_v16 = vsel %vm746_vm11, 1.0, %v1414_v12  ;;  %vm762_vm12 = vcmp.eq.s32.totalorder %v1797_v56, %v1569_v2 }
  0x60   : > { %599 = vmatpush.bf16.msra.mxu3 %v588_v61  ;;  %1106 = vmatmul.msk.bf16.vlgmr.msra.gmra.mxu2 %vm398_vm8, %v1749_v35  ;;  %vm763_vm13 = vcmp.eq.s32.totalorder %v1797_v56, %v1572_v3  ;;  %v770_v18 = vsel %vm762_vm12, 1.0, %v1414_v12  ;;  %vm617_vm14 = vcmp.eq.s32.totalorder %v1802_v60, %v1569_v2  ;;  %vm618_vm15 = vcmp.eq.s32.totalorder %v1802_v60, %v1572_v3 }
  0x61   : > { %v462_v10 = vpack.c.bf16 %v457_v14, %v456_v9  ;;  %v771_v19 = vsel %vm763_vm13, 1.0, %v1414_v12  ;;  %v778_v21 = vsub.f32 %v753_v0, %v770_v18  ;;  %v625_v25 = vsel %vm617_vm14, 1.0, %v1414_v12 }
  0x62   : > { %v779_v27 = vsub.f32 %v754_v16, %v771_v19  ;;  %v626_v28 = vsel %vm618_vm15, 1.0, %v1414_v12  ;;  %vm634_vm0 = vcmp.eq.s32.totalorder %v1816_v13, %v1569_v2  ;;  %vm635_vm1 = vcmp.eq.s32.totalorder %v1816_v13, %v1572_v3 }
  0x63   : > { %469 = vmatpush.bf16.msrb.mxu1 %v462_v10  ;;  %1107 = vmatmul.msk.bf16.vlgmr.msra.gmra.mxu3 %vm398_vm8, %v1749_v35  ;;  %v642_v31 = vsel %vm634_vm0, 1.0, %v1414_v12  ;;  %v643_v32 = vsel %vm635_vm1, 1.0, %v1414_v12  ;;  %vm809_vm2 = vcmp.eq.s32.totalorder %v1822_v17, %v1569_v2  ;;  %vm810_vm3 = vcmp.eq.s32.totalorder %v1822_v17, %v1572_v3 }
  0x64   : > { %v783_v33 = vpack.c.bf16 %v779_v27, %v778_v21  ;;  %v650_v34 = vsub.f32 %v625_v25, %v642_v31  ;;  %v651_v36 = vsub.f32 %v626_v28, %v643_v32  ;;  %v817_v37 = vsel %vm809_vm2, 1.0, %v1414_v12 }
  0x65   : > { %v818_v38 = vsel %vm810_vm3, 1.0, %v1414_v12  ;;  %vm826_vm4 = vcmp.eq.s32.totalorder %v1836_v26, %v1569_v2  ;;  %vm827_vm5 = vcmp.eq.s32.totalorder %v1836_v26, %v1572_v3  ;;  %vm421_vm6 = vcmp.eq.s32.totalorder %v1733_v24, %v1581_v6 }
  0x66   : > { %788 = vmatpush.bf16.msrb.mxu2 %v783_v33  ;;  %v655_v39 = vpack.c.bf16 %v651_v36, %v650_v34  ;;  %v834_v40 = vsel %vm826_vm4, 1.0, %v1414_v12  ;;  %v835_v41 = vsel %vm827_vm5, 1.0, %v1414_v12  ;;  %vm422_vm7 = vcmp.eq.s32.totalorder %v1733_v24, %v1584_v7 }
  0x67   : > { %v842_v42 = vsub.f32 %v817_v37, %v834_v40  ;;  %v843_v43 = vsub.f32 %v818_v38, %v835_v41  ;;  %v429_v44 = vsel %vm421_vm6, 1.0, %v1414_v12  ;;  %v430_v45 = vsel %vm422_vm7, 1.0, %v1414_v12  ;;  %v1937_v40 = vld [vmem:[%s1549_s17 + $0x5] ss:$0 sm:$0xff] }
  0x68   : > { %660 = vmatpush.bf16.msra.mxu0 %v655_v39  ;;  %vm438_vm9 = vcmp.eq.s32.totalorder %v1738_v30, %v1581_v6  ;;  %vm439_vm10 = vcmp.eq.s32.totalorder %v1738_v30, %v1584_v7  ;;  %vm743_vm11 = vcmp.eq.s32.totalorder %v1783_v53, %v1575_v4  ;;  %vm744_vm12 = vcmp.eq.s32.totalorder %v1783_v53, %v1578_v5 }
  0x69   : > { %v847_v46 = vpack.c.bf16 %v843_v43, %v842_v42  ;;  %v446_v47 = vsel %vm438_vm9, 1.0, %v1414_v12  ;;  %v447_v48 = vsel %vm439_vm10, 1.0, %v1414_v12  ;;  %v751_v49 = vsel %vm743_vm11, 1.0, %v1414_v12 }
  0x6a   : > { %v454_v50 = vsub.f32 %v429_v44, %v446_v47  ;;  %v455_v11 = vsub.f32 %v430_v45, %v447_v48  ;;  %v752_v51 = vsel %vm744_vm12, 1.0, %v1414_v12  ;;  %vm760_vm13 = vcmp.eq.s32.totalorder %v1797_v56, %v1575_v4 }
  0x6b   : > { %852 = vmatpush.bf16.msrb.mxu3 %v847_v46  ;;  %vm761_vm14 = vcmp.eq.s32.totalorder %v1797_v56, %v1578_v5  ;;  %v768_v52 = vsel %vm760_vm13, 1.0, %v1414_v12  ;;  %vm615_vm15 = vcmp.eq.s32.totalorder %v1802_v60, %v1575_v4  ;;  %vm616_vm0 = vcmp.eq.s32.totalorder %v1802_v60, %v1578_v5 }
  0x6c   : > { %v461_v15 = vpack.c.bf16 %v455_v11, %v454_v50  ;;  %v769_v54 = vsel %vm761_vm14, 1.0, %v1414_v12  ;;  %v776_v20 = vsub.f32 %v751_v49, %v768_v52  ;;  %v623_v55 = vsel %vm615_vm15, 1.0, %v1414_v12  ;;  %v1952_v49 = vld [vmem:[%s1556_s22 + $0x5] ss:$0 sm:$0xff]  ;;  %s956_s22 = sshll.u32 %s331_s26, 4  ;;  %s957_s22 = int_to_ptr.vmem [resolvable:$true] %s956_s22 }
  0x6d   : > { %v777_v57 = vsub.f32 %v752_v51, %v769_v54  ;;  %v624_v58 = vsel %vm616_vm0, 1.0, %v1414_v12  ;;  %vm632_vm1 = vcmp.eq.s32.totalorder %v1816_v13, %v1575_v4  ;;  %vm633_vm2 = vcmp.eq.s32.totalorder %v1816_v13, %v1578_v5 }
  0x6e   : > { %470 = vmatpush.bf16.msrb.mxu1 %v461_v15  ;;  %v640_v59 = vsel %vm632_vm1, 1.0, %v1414_v12  ;;  %v641_v29 = vsel %vm633_vm2, 1.0, %v1414_v12  ;;  %vm807_vm3 = vcmp.eq.s32.totalorder %v1822_v17, %v1575_v4  ;;  %vm808_vm4 = vcmp.eq.s32.totalorder %v1822_v17, %v1578_v5 }
  0x6f   : > { %v782_v61 = vpack.c.bf16 %v777_v57, %v776_v20  ;;  %v648_v62 = vsub.f32 %v623_v55, %v640_v59  ;;  %v649_v63 = vsub.f32 %v624_v58, %v641_v29  ;;  %v815_v0 = vsel %vm807_vm3, 1.0, %v1414_v12 }
  0x70   : > { %v816_v9 = vsel %vm808_vm4, 1.0, %v1414_v12  ;;  %vm824_vm5 = vcmp.eq.s32.totalorder %v1836_v26, %v1575_v4  ;;  %vm825_vm6 = vcmp.eq.s32.totalorder %v1836_v26, %v1578_v5  ;;  %vm419_vm7 = vcmp.eq.s32.totalorder %v1733_v24, %v1566_v1 }
  0x71   : > { %789 = vmatpush.bf16.msrb.mxu2 %v782_v61  ;;  %v654_v14 = vpack.c.bf16 %v649_v63, %v648_v62  ;;  %v832_v16 = vsel %vm824_vm5, 1.0, %v1414_v12  ;;  %v833_v18 = vsel %vm825_vm6, 1.0, %v1414_v12  ;;  %vm420_vm9 = vcmp.eq.s32.totalorder %v1733_v24, %v1587_v8 }
  0x72   : > { %v840_v10 = vsub.f32 %v815_v0, %v832_v16  ;;  %v841_v19 = vsub.f32 %v816_v9, %v833_v18  ;;  %v427_v21 = vsel %vm419_vm7, 1.0, %v1414_v12  ;;  %v428_v25 = vsel %vm420_vm9, 1.0, %v1414_v12 }
  0x73   : > { %661 = vmatpush.bf16.msra.mxu0 %v654_v14  ;;  %vm436_vm10 = vcmp.eq.s32.totalorder %v1738_v30, %v1566_v1  ;;  %vm437_vm11 = vcmp.eq.s32.totalorder %v1738_v30, %v1587_v8  ;;  %vm741_vm12 = vcmp.eq.s32.totalorder %v1783_v53, %v1581_v6  ;;  %vm742_vm13 = vcmp.eq.s32.totalorder %v1783_v53, %v1584_v7 }
  0x74   : > { %v846_v24 = vpack.c.bf16 %v841_v19, %v840_v10  ;;  %v444_v27 = vsel %vm436_vm10, 1.0, %v1414_v12  ;;  %v445_v28 = vsel %vm437_vm11, 1.0, %v1414_v12  ;;  %v749_v31 = vsel %vm741_vm12, 1.0, %v1414_v12 }
  0x75   : > { %v452_v32 = vsub.f32 %v427_v21, %v444_v27  ;;  %v453_v33 = vsub.f32 %v428_v25, %v445_v28  ;;  %v750_v34 = vsel %vm742_vm13, 1.0, %v1414_v12  ;;  %vm758_vm14 = vcmp.eq.s32.totalorder %v1797_v56, %v1581_v6 }
  0x76   : > { %853 = vmatpush.bf16.msrb.mxu3 %v846_v24  ;;  %vm759_vm15 = vcmp.eq.s32.totalorder %v1797_v56, %v1584_v7  ;;  %v766_v30 = vsel %vm758_vm14, 1.0, %v1414_v12  ;;  %vm613_vm0 = vcmp.eq.s32.totalorder %v1802_v60, %v1581_v6  ;;  %vm614_vm1 = vcmp.eq.s32.totalorder %v1802_v60, %v1584_v7 }
  0x77   : > { %v460_v36 = vpack.c.bf16 %v453_v33, %v452_v32  ;;  %v767_v37 = vsel %vm759_vm15, 1.0, %v1414_v12  ;;  %v774_v38 = vsub.f32 %v749_v31, %v766_v30  ;;  %v621_v39 = vsel %vm613_vm0, 1.0, %v1414_v12 }
  0x78   : > { %v775_v41 = vsub.f32 %v750_v34, %v767_v37  ;;  %v622_v42 = vsel %vm614_vm1, 1.0, %v1414_v12  ;;  %vm630_vm2 = vcmp.eq.s32.totalorder %v1816_v13, %v1581_v6  ;;  %vm631_vm3 = vcmp.eq.s32.totalorder %v1816_v13, %v1584_v7 }
  0x79   : > { %471 = vmatpush.bf16.msrb.mxu1 %v460_v36  ;;  %v638_v43 = vsel %vm630_vm2, 1.0, %v1414_v12  ;;  %v639_v44 = vsel %vm631_vm3, 1.0, %v1414_v12  ;;  %vm805_vm4 = vcmp.eq.s32.totalorder %v1822_v17, %v1581_v6  ;;  %vm806_vm5 = vcmp.eq.s32.totalorder %v1822_v17, %v1584_v7 }
  0x7a   : > { %v781_v45 = vpack.c.bf16 %v775_v41, %v774_v38  ;;  %v646_v46 = vsub.f32 %v621_v39, %v638_v43  ;;  %v647_v47 = vsub.f32 %v622_v42, %v639_v44  ;;  %v813_v48 = vsel %vm805_vm4, 1.0, %v1414_v12 }
  0x7b   : > { %v814_v50 = vsel %vm806_vm5, 1.0, %v1414_v12  ;;  %vm822_vm6 = vcmp.eq.s32.totalorder %v1836_v26, %v1581_v6  ;;  %vm823_vm7 = vcmp.eq.s32.totalorder %v1836_v26, %v1584_v7  ;;  %vm681_vm9 = vcmp.eq.s32.totalorder %v1937_v40, %v1569_v2 }
  0x7c   : > { %790 = vmatpush.bf16.msrb.mxu2 %v781_v45  ;;  %v653_v11 = vpack.c.bf16 %v647_v47, %v646_v46  ;;  %v830_v51 = vsel %vm822_vm6, 1.0, %v1414_v12  ;;  %v831_v52 = vsel %vm823_vm7, 1.0, %v1414_v12  ;;  %1105 = vmatmul.msk.bf16.vlgmr.msrb.gmra.mxu1 %vm398_vm8, %v1749_v35  ;;  %vm682_vm10 = vcmp.eq.s32.totalorder %v1937_v40, %v1572_v3 }
  0x7d   : > { %v838_v15 = vsub.f32 %v813_v48, %v830_v51  ;;  %v839_v54 = vsub.f32 %v814_v50, %v831_v52  ;;  %v689_v20 = vsel %vm681_vm9, 1.0, %v1414_v12  ;;  %v690_v55 = vsel %vm682_vm10, 1.0, %v1414_v12 }
  0x7e   : > { %662 = vmatpush.bf16.msra.mxu0 %v653_v11  ;;  %vm698_vm11 = vcmp.eq.s32.totalorder %v1952_v49, %v1569_v2  ;;  %vm699_vm12 = vcmp.eq.s32.totalorder %v1952_v49, %v1572_v3  ;;  %vm739_vm13 = vcmp.eq.s32.totalorder %v1783_v53, %v1566_v1  ;;  %vm740_vm14 = vcmp.eq.s32.totalorder %v1783_v53, %v1587_v8 }
  0x7f   : > { %v845_v57 = vpack.c.bf16 %v839_v54, %v838_v15  ;;  %v706_v58 = vsel %vm698_vm11, 1.0, %v1414_v12  ;;  %v707_v59 = vsel %vm699_vm12, 1.0, %v1414_v12  ;;  %v747_v29 = vsel %vm739_vm13, 1.0, %v1414_v12 }
  0x80   : > { %v714_v61 = vsub.f32 %v689_v20, %v706_v58  ;;  %v715_v62 = vsub.f32 %v690_v55, %v707_v59  ;;  %v748_v2 = vsel %vm740_vm14, 1.0, %v1414_v12  ;;  %vm756_vm15 = vcmp.eq.s32.totalorder %v1797_v56, %v1566_v1 }
  0x81   : > { %854 = vmatpush.bf16.msrb.mxu3 %v845_v57  ;;  %vm757_vm0 = vcmp.eq.s32.totalorder %v1797_v56, %v1587_v8  ;;  %v764_v3 = vsel %vm756_vm15, 1.0, %v1414_v12  ;;  %vm611_vm1 = vcmp.eq.s32.totalorder %v1802_v60, %v1566_v1  ;;  %vm612_vm2 = vcmp.eq.s32.totalorder %v1802_v60, %v1587_v8 }
  0x82   : > { %v719_v53 = vpack.c.bf16 %v715_v62, %v714_v61  ;;  %v765_v63 = vsel %vm757_vm0, 1.0, %v1414_v12  ;;  %v772_v0 = vsub.f32 %v747_v29, %v764_v3  ;;  %v619_v9 = vsel %vm611_vm1, 1.0, %v1414_v12  ;;  %v868_v29 = vld [vmem:[%s2118_s4] sm:$0xff] }
  0x83   : > { %v773_v14 = vsub.f32 %v748_v2, %v765_v63  ;;  %v620_v16 = vsel %vm612_vm2, 1.0, %v1414_v12  ;;  %vm628_vm3 = vcmp.eq.s32.totalorder %v1816_v13, %v1566_v1  ;;  %vm629_vm4 = vcmp.eq.s32.totalorder %v1816_v13, %v1587_v8  ;;  %v871_v63 = vld [vmem:[%s2118_s4 + $0x18] sm:$0xff] }
  0x84   : > { %724 = vmatpush.bf16.msra.mxu1 %v719_v53  ;;  %v636_v56 = vsel %vm628_vm3, 1.0, %v1414_v12  ;;  %v637_v60 = vsel %vm629_vm4, 1.0, %v1414_v12  ;;  %vm803_vm5 = vcmp.eq.s32.totalorder %v1822_v17, %v1566_v1  ;;  %vm804_vm6 = vcmp.eq.s32.totalorder %v1822_v17, %v1587_v8 }
  0x85   : > { %v780_v18 = vpack.c.bf16 %v773_v14, %v772_v0  ;;  %v644_v10 = vsub.f32 %v619_v9, %v636_v56  ;;  %v645_v19 = vsub.f32 %v620_v16, %v637_v60  ;;  %v811_v21 = vsel %vm803_vm5, 1.0, %v1414_v12  ;;  %v869_v0 = vld [vmem:[%s2118_s4 + $0x8] sm:$0xff] }
  0x86   : > { %v812_v25 = vsel %vm804_vm6, 1.0, %v1414_v12  ;;  %vm820_vm7 = vcmp.eq.s32.totalorder %v1836_v26, %v1566_v1  ;;  %vm821_vm9 = vcmp.eq.s32.totalorder %v1836_v26, %v1587_v8  ;;  %vm679_vm10 = vcmp.eq.s32.totalorder %v1937_v40, %v1575_v4 }
  0x87   : > { %791 = vmatpush.bf16.msrb.mxu2 %v780_v18  ;;  %v652_v13 = vpack.c.bf16 %v645_v19, %v644_v10  ;;  %v828_v17 = vsel %vm820_vm7, 1.0, %v1414_v12  ;;  %v829_v24 = vsel %vm821_vm9, 1.0, %v1414_v12  ;;  %vm680_vm11 = vcmp.eq.s32.totalorder %v1937_v40, %v1578_v5 }
  0x88   : > { %v836_v27 = vsub.f32 %v811_v21, %v828_v17  ;;  %v837_v28 = vsub.f32 %v812_v25, %v829_v24  ;;  %v687_v31 = vsel %vm679_vm10, 1.0, %v1414_v12  ;;  %v688_v32 = vsel %vm680_vm11, 1.0, %v1414_v12  ;;  %v867_v17 = vld [vmem:[#allocation7 + $0x18] sm:$0xff]  ;;  %v865_v24 = vld [vmem:[#allocation7 + $0x8] sm:$0xff] }
  0x89   : > { %663 = vmatpush.bf16.msra.mxu0 %v652_v13  ;;  %vm696_vm12 = vcmp.eq.s32.totalorder %v1952_v49, %v1575_v4  ;;  %vm697_vm13 = vcmp.eq.s32.totalorder %v1952_v49, %v1578_v5  ;;  %vm677_vm14 = vcmp.eq.s32.totalorder %v1937_v40, %v1581_v6  ;;  %vm678_vm15 = vcmp.eq.s32.totalorder %v1937_v40, %v1584_v7  ;;  %v864_v13 = vld [vmem:[#allocation7] sm:$0xff] }
  0x8a   : > { %v844_v26 = vpack.c.bf16 %v837_v28, %v836_v27  ;;  %1110 = vmatmul.msk.bf16.vlgmr.msrb.gmra.mxu2 %vm398_vm8, %v1749_v35  ;;  %v704_v33 = vsel %vm696_vm12, 1.0, %v1414_v12  ;;  %v705_v34 = vsel %vm697_vm13, 1.0, %v1414_v12  ;;  %v685_v30 = vsel %vm677_vm14, 1.0, %v1414_v12  ;;  %v866_v27 = vld [vmem:[#allocation7 + $0x10] sm:$0xff] }
  0x8b   : > { %v712_v4 = vsub.f32 %v687_v31, %v704_v33  ;;  %v713_v36 = vsub.f32 %v688_v32, %v705_v34  ;;  %v686_v5 = vsel %vm678_vm15, 1.0, %v1414_v12  ;;  %vm694_vm0 = vcmp.eq.s32.totalorder %v1952_v49, %v1581_v6 }
  0x8c   : > { %855 = vmatpush.bf16.msrb.mxu3 %v844_v26  ;;  %1108 = vmatmul.msk.bf16.vlgmr.msra.gmra.mxu0 %vm398_vm8, %v1749_v35  ;;  %vm695_vm1 = vcmp.eq.s32.totalorder %v1952_v49, %v1584_v7  ;;  %v702_v37 = vsel %vm694_vm0, 1.0, %v1414_v12  ;;  %vm675_vm2 = vcmp.eq.s32.totalorder %v1937_v40, %v1566_v1  ;;  %vm676_vm3 = vcmp.eq.s32.totalorder %v1937_v40, %v1587_v8 }
  0x8d   : > { %v718_v38 = vpack.c.bf16 %v713_v36, %v712_v4  ;;  %v703_v39 = vsel %vm695_vm1, 1.0, %v1414_v12  ;;  %v710_v41 = vsub.f32 %v685_v30, %v702_v37  ;;  %v683_v6 = vsel %vm675_vm2, 1.0, %v1414_v12 }
  0x8e   : > { %v711_v42 = vsub.f32 %v686_v5, %v703_v39  ;;  %v684_v43 = vsel %vm676_vm3, 1.0, %v1414_v12  ;;  %vm692_vm4 = vcmp.eq.s32.totalorder %v1952_v49, %v1566_v1  ;;  %vm693_vm5 = vcmp.eq.s32.totalorder %v1952_v49, %v1587_v8 }
  0x8f   : > { %725 = vmatpush.bf16.msra.mxu1 %v718_v38  ;;  %1111 = vmatmul.msk.bf16.vlgmr.msrb.gmra.mxu3 %vm398_vm8, %v1749_v35  ;;  %v700_v7 = vsel %vm692_vm4, 1.0, %v1414_v12  ;;  %v701_v40 = vsel %vm693_vm5, 1.0, %v1414_v12  ;;  %v1415_v59 = vmov 0   ;;  %vm892_vm6 = vcmask 261120  }
  0x90   : > { %v717_v44 = vpack.c.bf16 %v711_v42, %v710_v41  ;;  %v708_v45 = vsub.f32 %v683_v6, %v700_v7  ;;  %v709_v46 = vsub.f32 %v684_v43, %v701_v40  ;;  %1212 = vset.pattern.permute.xlu1 %v1415_v59  ;;  %1211 = vset.pattern.permute.xlu0 %v1415_v59 }
  0x91   : > { %874 = vperm.xlu0 %1211, %v868_v29  }
  0x92   : > { %v716_v47 = vpack.c.bf16 %v709_v46, %v708_v45 }
  0x93   : > { %726 = vmatpush.bf16.msra.mxu1 %v717_v44 }
  0x97   : > { %727 = vmatpush.bf16.msra.mxu1 %v716_v47 }
  0x99   : > { %879 = vperm.xlu0 %1211, %v869_v0  }
  0x9a   : > { %1109 = vmatmul.msk.bf16.vlgmr.msra.gmra.mxu1 %vm398_vm8, %v1749_v35  ;;  %v870_v35 = vld [vmem:[%s2118_s4 + $0x10] sm:$0xff] }
  0x9b   : > { %884 = vperm.xlu1 %1212, %v870_v35  }
  0xa3   : > { %889 = vperm.xlu1 %1212, %v871_v63  }
  0xd2   : > { %v411_v1 = vpop.f32.mrf.mxu1 }
  0xda   : > { %v413_v48 = vpop.f32.mrf.mxu1 }
  0xe3   : > { %v537_v8 = vpop.f32.mrf.mxu2 }
  0xe6   : > { %v601_v50 = vpop.f32.mrf.mxu3 }
  0xeb   : > { %v539_v11 = vpop.f32.mrf.mxu2 }
  0xee   : > { %v603_v52 = vpop.f32.mrf.mxu3 }
  0xf9   : > { %v473_v49 = vpop.f32.mrf.mxu1 }
  0xfa   : > { %v478_v15 = vmax.f32 %v411_v1, %v473_v49 }
  0xfc   : > { %v542_v20 = vmax.f32 %v478_v15, %v537_v8 }
  0xfe   : > { %v606_v61 = vmax.f32 %v542_v20, %v601_v50 }
 0x101   : > { %v475_v51 = vpop.f32.mrf.mxu1 }
 0x102   : > { %v479_v12 = vmax.f32 %v413_v48, %v475_v51 }
 0x103   : > { %v875_v31 = vpop.permute.xlu0 %874 }
 0x104   : > { %v543_v55 = vmax.f32 %v479_v12, %v539_v11 }
 0x106   : > { %v607_v2 = vmax.f32 %v543_v55, %v603_v52 }
 0x109   : > { %v665_v54 = vpop.f32.mrf.mxu0 }
 0x10a   : > { %v670_v53 = vmax.f32 %v606_v61, %v665_v54 }
 0x10d   : > { %v793_v57 = vpop.f32.mrf.mxu2  ;;  %v885_v28 = vpop.permute.xlu1 %884 }
 0x111   : > { %v667_v3 = vpop.f32.mrf.mxu0 }
 0x112   : > { %v857_v62 = vpop.f32.mrf.mxu3  ;;  %v671_v9 = vmax.f32 %v607_v2, %v667_v3 }
 0x115   : > { %v795_v60 = vpop.f32.mrf.mxu2  ;;  %v890_v34 = vpop.permute.xlu1 %889 }
 0x117   : > { %v729_v58 = vpop.f32.mrf.mxu1 }
 0x118   : > { %v734_v14 = vmax.f32 %v670_v53, %v729_v58 }
 0x11a   : > { %v798_v18 = vmax.f32 %v734_v14, %v793_v57  ;;  %v859_v19 = vpop.f32.mrf.mxu3 }
 0x11c   : > { %v862_v25 = vmax.f32 %v798_v18, %v857_v62 }
 0x11f   : > { %v731_v16 = vpop.f32.mrf.mxu1 }
 0x120   : > { %v735_v56 = vmax.f32 %v671_v9, %v731_v16 }
 0x122   : > { %v799_v10 = vmax.f32 %v735_v56, %v795_v60 }
 0x124   : > { %v863_v21 = vmax.f32 %v799_v10, %v859_v19 }
 0x126   : > { %917 = vmatpush.msrb.mxu0 %v863_v21  ;;  %1123 = vmatpush.msra.mxu2 %v863_v21 }
 0x128   : > { %918 = vmatpush.msrb.mxu0 %v862_v25  ;;  %1124 = vmatpush.msra.mxu2 %v862_v25 }
 0x12a   : > { %919 = vmatpush.msrb.mxu0 %v1730_v23  ;;  %1125 = vmatpush.msra.mxu2 %v1730_v23  ;;  %v880_v23 = vpop.permute.xlu0 %879 }
 0x12c   : > { %920 = vmatpush.msrb.mxu0 %v1728_v22  ;;  %1126 = vmatpush.msra.mxu2 %v1728_v22 }
 0x12d   : > { %1112 = vmatmul.msk.f32.vlgmr.msrb.gmra.mxu0 %vm892_vm6, %v864_v13  ;;  %1115 = vmatmul.msk.f32.vlgmr.msra.gmra.mxu2 %vm892_vm6, %v867_v17 }
 0x135   : > { %1113 = vmatmul.msk.f32.gmra.mxu0 %vm892_vm6, %v865_v24 }
 0x13d   : > { %1114 = vmatmul.msk.f32.gmra.mxu0 %vm892_vm6, %v866_v27 }
 0x1aa   : > { %v922_v32 = vpop.f32.mrf.mxu0 }
 0x1ab   : > { %v923_v26 = vadd.f32 %v922_v32, %v875_v31 }
 0x1ad   : > { %v934_v33 = vmax.f32 %v923_v26, 0.0 }
 0x1af   : > { %938 = vst.msk [vmem:[%s331_s26] sm:$0xff] %vm398_vm8, %v934_v33 }
 0x1b0   : > { %v931_v30 = vpop.f32.mrf.mxu2 }
 0x1b1   : > { %v932_v22 = vadd.f32 %v931_v30, %v890_v34 }
 0x1b2   : > { %v925_v4 = vpop.f32.mrf.mxu0 }
 0x1b3   : > { %v926_v36 = vadd.f32 %v925_v4, %v880_v23  ;;  %v937_v5 = vmax.f32 %v932_v22, 0.0 }
 0x1b5   : > { %v935_v37 = vmax.f32 %v926_v36, 0.0  ;;  %941 = vst.msk [vmem:[%s331_s26 + $0x18] sm:$0xff] %vm398_vm8, %v937_v5 }
 0x1b7   : > { %939 = vst.msk [vmem:[%s331_s26 + $0x8] sm:$0xff] %vm398_vm8, %v935_v37 }
 0x1ba   : > { %v928_v38 = vpop.f32.mrf.mxu0 }
 0x1bb   : > { %v929_v39 = vadd.f32 %v928_v38, %v885_v28 }
 0x1bd   : > { %v936_v41 = vmax.f32 %v929_v39, 0.0 }
 0x1bf   : > { %940 = vst.msk [vmem:[%s331_s26 + $0x10] sm:$0xff] %vm398_vm8, %v936_v41 }
 0x1c0   : > { %1346 = shalt.err (!%p1343_p0)
}
 0x1c1   : > { %s1416_s11 = smov 128   ;;  %s1417_s6 = smov 8  }
 0x1c2   : > { %1135 = dma.vmem_to_hbm [thread:$0]  (%p1519_p4), %s957_s22, 512, %s959_s24, %s943_s21, %s1416_s11, %s1416_s11, %s1417_s6  }
 0x1c3 PF: > { %s973_s8 = sand.u32 1, %s1389_s18   ;;  %p1149_p2 = pnand %p1092_p6, %p1527_p7 }
 0x1c4   : > { %s974_s10 = scalar_lea.sflag [#allocation4], %s973_s8 }
 0x1c5   : > { %p1150_p5 = pneg %p1149_p2 }
 0x1c7   : > { %1384 = dma.done.wait (%p1150_p5), %s974_s10, 512  }
 0x1c8   : > { %1386 = vsyncadd (%p1150_p5), %s974_s10, 4294966784  ;;  %s24_s23 = sadd.s32 1, %s1409_s23   ;;  %s2137_s13 = sld [smem:[#allocation13_spill]] }
 0x1c9   : > { %p21_p8 = scmp.ge.s32.totalorder %s24_s23, 4   ;;  %s2138_s20 = sld [smem:[#allocation16_spill]] }
 0x1ca   : > { %s2139_s21 = sld [smem:[#allocation14_spill]]  ;;  %s2141_s18 = smov %s1393_s19 }
 0x1cb   : > { %s2140_s22 = sld [smem:[#allocation15_spill]]  ;;  %23 = sbr.rel (!%p21_p8) target bundleno = 10 (0xa), region = 105 }
 0x1ce   : > { %s2142_s19 = smov %s2137_s13 }
 0x1d0   :  { %980 = vsyncpa [#allocation3], 1 }
 0x1d1   :  { %982 = vsyncpa [#allocation3 + $0x1], 1 }
 0x1d2   :  { %983 = vsyncpa [#allocation6], 1 }
 0x1d3   :  { %985 = vsyncpa [#allocation6 + $0x1], 1 }
 0x1d4   :  { %986 = vsyncpa [#allocation4], 1 }
 0x1d5   :  { %988 = vsyncpa [#allocation4 + $0x1], 1 }

</bundles_post_ra>
